<compile_context>
chip_gen: v7x
topology: tpu7x:2x2x1
jax: 0.10.0
libtpu: 0.0.40
codegen_flags: <defaults>
</compile_context>

<pallas_src>
import functools
from typing import List, Tuple

import jax
import jax.numpy as jnp
from jax.experimental import pallas as pl
from jax.experimental.pallas import tpu as pltpu


def _round_up(x: int, m: int) -> int:
    return ((x + m - 1) // m) * m


def _linear_act_kernel(x_ref, w_ref, b_ref, o_ref, acc_ref, *, apply_relu: bool):
    """One (tm, tn) output tile of  act(x @ W + b).

    Grid is (M//tm, N//tn, K//tk) with K innermost (reduction axis last).
    The f32 accumulator lives in VMEM scratch: zero-init under k==0, and the
    bias add + activation + dtype cast happen exactly once under k==last, so
    the hidden activation never round-trips through HBM in a partial state.
    """
    k = pl.program_id(2)

    @pl.when(k == 0)
    def _():
        acc_ref[...] = jnp.zeros_like(acc_ref)

    acc_ref[...] += jnp.dot(
        x_ref[...], w_ref[...], preferred_element_type=jnp.float32
    )

    @pl.when(k == pl.num_programs(2) - 1)
    def _():
        # f32 epilogue (bias + ReLU on VPU; free while MXU is the binding unit),
        # cast to the output dtype only at the store.
        out = acc_ref[...] + b_ref[...].astype(jnp.float32)
        if apply_relu:
            out = jnp.maximum(out, 0.0)
        o_ref[...] = out.astype(o_ref.dtype)


def linear_act(x, w, b, *, apply_relu: bool,
               tm: int = 256, tn: int = 512, tk: int = 256):
    """Fused y = act(x @ w + b).  x: (M, K), w: (K, N), b: (N,).

    Default tiles (tm=256, tn=512, tk=256) fit comfortably inside the scoped
    VMEM budget of v5e/v6e (128 MiB physical) AND v7x (64 MiB physical) with
    double-buffered inputs; tiles are clamped to the (padded) problem size so
    tiny layers do not over-pad, while staying (8, 128) aligned so output
    stores stay lane-dense (unmasked vst).
    """
    M, K = x.shape
    Kw, N = w.shape
    assert K == Kw and b.shape == (N,)
    out_dtype = x.dtype

    tm = min(tm, _round_up(M, 8))
    tn = min(tn, _round_up(N, 128))
    tk = min(tk, _round_up(K, 128))

    Mp, Kp, Np = _round_up(M, tm), _round_up(K, tk), _round_up(N, tn)
    xp = jnp.pad(x, ((0, Mp - M), (0, Kp - K)))
    wp = jnp.pad(w, ((0, Kp - K), (0, Np - N)))
    bp = jnp.pad(b, (0, Np - N)).reshape(1, Np)

    grid = (Mp // tm, Np // tn, Kp // tk)
    kernel = functools.partial(_linear_act_kernel, apply_relu=apply_relu)

    out = pl.pallas_call(
        kernel,
        out_shape=jax.ShapeDtypeStruct((Mp, Np), out_dtype),
        grid_spec=pltpu.PrefetchScalarGridSpec(
            num_scalar_prefetch=0,
            grid=grid,
            in_specs=[
                pl.BlockSpec((tm, tk), lambda i, j, k: (i, k)),   # x tile
                pl.BlockSpec((tk, tn), lambda i, j, k: (k, j)),   # W tile
                pl.BlockSpec((1, tn), lambda i, j, k: (0, j)),    # bias tile
            ],
            out_specs=pl.BlockSpec((tm, tn), lambda i, j, k: (i, j)),
            scratch_shapes=[pltpu.VMEM((tm, tn), jnp.float32)],
        ),
        compiler_params=pltpu.CompilerParams(
            # M/N parallel (megacore-shardable on v7x), K reduction arbitrary.
            dimension_semantics=("parallel", "parallel", "arbitrary"),
            vmem_limit_bytes=64 * 1024 * 1024,
        ),
    )(xp, wp, bp)
    return out[:M, :N]


def mlp_init_params(key, input_dim: int, layer_dims: List[int],
                    dtype=jnp.float32) -> List[Tuple[jnp.ndarray, jnp.ndarray]]:
    """Orthogonal weights (gain = tanh gain 5/3, as in the torch module's
    self.apply(orthogonal_init)), zero biases.  Stored as (in_dim, out_dim).
    Initialization is host-side JAX, not a kernel (it is not part of forward).
    """
    params = []
    ortho = jax.nn.initializers.orthogonal(scale=5.0 / 3.0)
    in_dim = input_dim
    for out_dim in layer_dims:
        key, wk = jax.random.split(key)
        w = ortho(wk, (in_dim, out_dim), dtype)
        b = jnp.zeros((out_dim,), dtype)
        params.append((w, b))
        in_dim = out_dim
    return params


def mlp_forward(params, x):
    """MLP.forward: ReLU after every layer except the last (Identity)."""
    n = len(params)
    for idx, (w, b) in enumerate(params):
        x = linear_act(x, w, b, apply_relu=(idx < n - 1))
    return x


def mlp_reference(params, x):
    n = len(params)
    for idx, (w, b) in enumerate(params):
        x = x @ w + b
        if idx < n - 1:
            x = jnp.maximum(x, 0.0)
    return x


if __name__ == "__main__":
    key = jax.random.PRNGKey(0)
    batch, input_dim = 2, 32
    layer_dims = [64, 64, 8]          # ReLU, ReLU, Identity

    kp, kx = jax.random.split(key)
    params = mlp_init_params(kp, input_dim, layer_dims, dtype=jnp.float32)
    x = jax.random.normal(kx, (batch, input_dim), dtype=jnp.float32)

    y = mlp_forward(params, x)
    y = jax.block_until_ready(y)

    y_ref = mlp_reference(params, x)
    assert y.shape == (batch, layer_dims[-1])
    max_err = float(jnp.max(jnp.abs(y - y_ref)))
    assert jnp.allclose(y, y_ref, atol=1e-5, rtol=1e-5), f"max_err={max_err}"

    print("KERNEL_OK")
</pallas_src>

<mosaic_0001>
module attributes {stable_mosaic.version = 11 : i64} {
  func.func @_linear_act_kernel(%arg0: i32, %arg1: i32, %arg2: i32, %arg3: memref<8x128xf32, #tpu.memory_space<vmem>>, %arg4: memref<128x128xf32, #tpu.memory_space<vmem>>, %arg5: memref<1x128xf32, #tpu.memory_space<vmem>>, %arg6: memref<8x128xf32, #tpu.memory_space<vmem>>, %arg7: memref<8x128xf32, #tpu.memory_space<vmem>>) attributes {dimension_semantics = [#tpu.dimension_semantics<parallel>, #tpu.dimension_semantics<parallel>, #tpu.dimension_semantics<arbitrary>], iteration_bounds = array<i64: 1, 1, 1>, scalar_prefetch = 0 : i64, scratch_operands = 1 : i64, tpu.core_type = #tpu.core_type<tc>, window_params = [{transform_indices = @transform_0, window_bounds = array<i64: 8, 128>}, {transform_indices = @transform_1, window_bounds = array<i64: 128, 128>}, {transform_indices = @transform_2, window_bounds = array<i64: 1, 128>}, {transform_indices = @transform_3, window_bounds = array<i64: 8, 128>}]} {
    %c0_i32 = arith.constant 0 : i32
    %0 = arith.cmpi eq, %arg2, %c0_i32 : i32
    %1 = arith.extui %0 : i1 to i32
    %c0_i32_0 = arith.constant 0 : i32
    %2 = arith.cmpi ne, %1, %c0_i32_0 : i32
    scf.if %2 {
      %cst_10 = arith.constant 0.000000e+00 : f32
      %12 = vector.broadcast %cst_10 : f32 to vector<8x128xf32>
      %c0_11 = arith.constant 0 : index
      %c0_12 = arith.constant 0 : index
      %13 = vector.load %arg7[%c0_11, %c0_12] : memref<8x128xf32, #tpu.memory_space<vmem>>, vector<8x128xf32>
      tpu.vector_store %arg7[%c0_11, %c0_12], %12 {strides = array<i32>} : memref<8x128xf32, #tpu.memory_space<vmem>>, vector<8x128xf32>,
    } else {
    }
    %c0 = arith.constant 0 : index
    %c0_1 = arith.constant 0 : index
    %3 = vector.load %arg7[%c0, %c0_1] : memref<8x128xf32, #tpu.memory_space<vmem>>, vector<8x128xf32>
    %c0_2 = arith.constant 0 : index
    %c0_3 = arith.constant 0 : index
    %4 = vector.load %arg3[%c0_2, %c0_3] : memref<8x128xf32, #tpu.memory_space<vmem>>, vector<8x128xf32>
    %c0_4 = arith.constant 0 : index
    %c0_5 = arith.constant 0 : index
    %5 = vector.load %arg4[%c0_4, %c0_5] : memref<128x128xf32, #tpu.memory_space<vmem>>, vector<128x128xf32>
    %cst = arith.constant dense<0.000000e+00> : vector<8x128xf32>
    %6 = tpu.matmul %4, %5, %cst {dimension_numbers = #tpu.dot_dimension_numbers<[1], [0], [0], [1], [0, 0, 1, 1], [], []>} : vector<8x128xf32>, vector<128x128xf32>, vector<8x128xf32> -> vector<8x128xf32>
    %7 = arith.addf %3, %6 : vector<8x128xf32>
    %c0_6 = arith.constant 0 : index
    %c0_7 = arith.constant 0 : index
    %8 = vector.load %arg7[%c0_6, %c0_7] : memref<8x128xf32, #tpu.memory_space<vmem>>, vector<8x128xf32>
    tpu.vector_store %arg7[%c0_6, %c0_7], %7 {strides = array<i32>} : memref<8x128xf32, #tpu.memory_space<vmem>>, vector<8x128xf32>,
    %c0_i32_8 = arith.constant 0 : i32
    %9 = arith.cmpi eq, %arg2, %c0_i32_8 : i32
    %10 = arith.extui %9 : i1 to i32
    %c0_i32_9 = arith.constant 0 : i32
    %11 = arith.cmpi ne, %10, %c0_i32_9 : i32
    scf.if %11 {
      %c0_10 = arith.constant 0 : index
      %c0_11 = arith.constant 0 : index
      %12 = vector.load %arg7[%c0_10, %c0_11] : memref<8x128xf32, #tpu.memory_space<vmem>>, vector<8x128xf32>
      %c0_12 = arith.constant 0 : index
      %c0_13 = arith.constant 0 : index
      %13 = vector.load %arg5[%c0_12, %c0_13] : memref<1x128xf32, #tpu.memory_space<vmem>>, vector<1x128xf32>
      %14 = vector.broadcast %13 : vector<1x128xf32> to vector<8x128xf32>
      %15 = arith.addf %12, %14 : vector<8x128xf32>
      %cst_14 = arith.constant 0.000000e+00 : f32
      %16 = vector.broadcast %cst_14 : f32 to vector<8x128xf32>
      %17 = arith.maximumf %15, %16 : vector<8x128xf32>
      %c0_15 = arith.constant 0 : index
      %c0_16 = arith.constant 0 : index
      %18 = vector.load %arg6[%c0_15, %c0_16] : memref<8x128xf32, #tpu.memory_space<vmem>>, vector<8x128xf32>
      tpu.vector_store %arg6[%c0_15, %c0_16], %17 {strides = array<i32>} : memref<8x128xf32, #tpu.memory_space<vmem>>, vector<8x128xf32>,
    } else {
    }
    return
  }
  func.func @transform_0(%arg0: i32, %arg1: i32, %arg2: i32) -> (i32, i32) {
    %c0_i32 = arith.constant 0 : i32
    return %arg0, %arg2 : i32, i32
  }
  func.func @transform_1(%arg0: i32, %arg1: i32, %arg2: i32) -> (i32, i32) {
    %c0_i32 = arith.constant 0 : i32
    return %arg2, %arg1 : i32, i32
  }
  func.func @transform_2(%arg0: i32, %arg1: i32, %arg2: i32) -> (i32, i32) {
    %c0_i32 = arith.constant 0 : i32
    %c0_i32_0 = arith.constant 0 : i32
    return %c0_i32, %arg1 : i32, i32
  }
  func.func @transform_3(%arg0: i32, %arg1: i32, %arg2: i32) -> (i32, i32) {
    %c0_i32 = arith.constant 0 : i32
    return %arg0, %arg1 : i32, i32
  }
}

</mosaic_0001>

<bundles_post_ra>
// kernel: tpu_custom_call.1
= control target key start
LH: loop header
LB: loop body
LE: loop exit
PB: predicated region body
PF: predicated region fallthrough
CT: control target
= control target key end

     0   :  { %8 = vsyncpa [#allocation4], 0  ;;  %s434_s0 = inlined_call_operand.hbm [shape: f32[8,128], index: 0, kind: input, shape index: {}]   ;;  %s435_s1 = inlined_call_operand.hbm [shape: f32[128,128], index: 1, kind: input, shape index: {}]   ;;  %s436_s2 = inlined_call_operand.hbm [shape: f32[1,128], index: 2, kind: input, shape index: {}]   ;;  %s437_s3 = inlined_call_operand.hbm [shape: f32[8,128], index: 3, kind: output, shape index: {}]  }
   0x1   :  { %9 = vsyncpa [#allocation7], 0 }
   0x2   :  { %10 = vsyncpa [#allocation5], 0  ;;  %s357_s12 = smov [#allocation6]   ;;  %s263_s16 = scalar_lea.hbm %s435_s1, 2048 }
   0x3   :  { %s26_s13 = sshll.u32 %s357_s12, 4  ;;  %p264_p0 = scmp.ne.s32.totalorder %s435_s1, %s263_s16  ;;  %s27_s13 = int_to_ptr.vmem [resolvable:$true] %s26_s13 }
   0x4   :  { %p267_p1 = scmp.lt.u32.totalorder %s263_s16, %s435_s1 }
   0x6   :  { %p269_p2 = pnand %p267_p1, %p264_p0 }
   0x8   :  { %272 = shalt.err (!%p269_p2)
}
   0x9   :  { %s273_s21 = scalar_lea.vmem %s27_s13, 2048  ;;  %p278_p4 = scmp.lt.s32.totalorder %s27_s13, %s27_s13 }
   0xa   :  { %p274_p3 = scmp.ne.s32.totalorder %s27_s13, %s273_s21  ;;  %p279_p5 = scmp.lt.s32.totalorder %s273_s21, %s273_s21 }
   0xc   :  { %p280_p6 = por %p279_p5, %p278_p4 }
   0xe   :  { %p281_p7 = pnand %p280_p6, %p274_p3 }
  0x10   :  { %284 = shalt.err (!%p281_p7)
}
  0x11   :  { %s358_s22 = smov 128   ;;  %s359_s23 = smov 8  }
  0x12   :  { %32 = dma.hbm_to_vmem [thread:$0]  %s435_s1, 2048, %s27_s13, [#allocation7], %s358_s22, %s358_s22, %s359_s23  }
  0x13   :  { %s360_s26 = smov [#allocation3]   ;;  %s361_s28 = smov [#allocation8]  }
  0x14   :  { %s17_s27 = sshll.u32 %s360_s26, 4  ;;  %s39_s29 = sshll.u32 %s361_s28, 4  ;;  %s18_s27 = int_to_ptr.vmem [resolvable:$true] %s17_s27  ;;  %s40_s29 = int_to_ptr.vmem [resolvable:$true] %s39_s29 }
  0x15   :  { %s285_s5 = scalar_lea.hbm %s434_s0, 128 }
  0x16   :  { %p286_p8 = scmp.ne.s32.totalorder %s434_s0, %s285_s5  ;;  %p289_p9 = scmp.lt.u32.totalorder %s285_s5, %s434_s0 }
  0x18   :  { %p291_p10 = pnand %p289_p9, %p286_p8 }
  0x1a   :  { %294 = shalt.err (!%p291_p10)
}
  0x1b   :  { %s295_s1 = scalar_lea.vmem %s18_s27, 128  ;;  %p300_p12 = scmp.lt.s32.totalorder %s18_s27, %s18_s27 }
  0x1c   :  { %p296_p11 = scmp.ne.s32.totalorder %s18_s27, %s295_s1  ;;  %p301_p13 = scmp.lt.s32.totalorder %s295_s1, %s295_s1 }
  0x1e   :  { %p302_p0 = por %p301_p13, %p300_p12 }
  0x20   :  { %p303_p1 = pnand %p302_p0, %p296_p11 }
  0x22   :  { %306 = shalt.err (!%p303_p1)
}
  0x23   :  { %20 = dma.hbm_to_vmem [thread:$0]  %s434_s0, 128, %s18_s27, [#allocation4]  }
  0x24   :  { %s307_s14 = scalar_lea.hbm %s436_s2, 16 }
  0x25   :  { %p308_p2 = scmp.ne.s32.totalorder %s436_s2, %s307_s14  ;;  %p311_p3 = scmp.lt.u32.totalorder %s307_s14, %s436_s2 }
  0x27   :  { %p313_p4 = pnand %p311_p3, %p308_p2 }
  0x29   :  { %316 = shalt.err (!%p313_p4)
}
  0x2a   :  { %s317_s19 = scalar_lea.vmem %s40_s29, 16  ;;  %s321_s20 = scalar_lea.vmem %s40_s29, 32 }
  0x2b   :  { %p318_p5 = scmp.ne.s32.totalorder %s40_s29, %s317_s19  ;;  %p322_p6 = scmp.lt.s32.totalorder %s40_s29, %s40_s29 }
  0x2c   :  { %p323_p7 = scmp.lt.s32.totalorder %s321_s20, %s317_s19 }
  0x2e   :  { %p324_p8 = por %p323_p7, %p322_p6 }
  0x30   :  { %p325_p9 = pnand %p324_p8, %p318_p5 }
  0x32   :  { %328 = shalt.err (!%p325_p9)
}
  0x33   :  { %42 = dma.hbm_to_vmem [thread:$0]  %s436_s2, 16, %s40_s29, [#allocation7]  }
  0x34   :  { %351 = dma.done.wait [#allocation4], 128  }
  0x35   :  { %352 = vsyncadd [#allocation4], 4294967168 }
  0x36   :  { %353 = dma.done.wait [#allocation7], 2064  }
  0x37   :  { %354 = vsyncadd [#allocation7], 4294965232  ;;  %v362_v0 = vmov 0.0|0.0   ;;  %vm363_vm0 = vmmov 0   ;;  %v364_v1 = vmov 0.0   ;;  %v59_v2 = vld [vmem:[#allocation6] sm:$0xff] }
  0x38   :  { %230 = vmatprep.subr.bf16.mxu0 %v362_v0  ;;  %227 = vmatprep.mubr.msk.f32.mxu0 %vm363_vm0, %v364_v1  ;;  %v60_v3 = vld [vmem:[#allocation6 + $0x8] sm:$0xff]  ;;  %v61_v4 = vld [vmem:[#allocation6 + $0x10] sm:$0xff]  ;;  %v62_v6 = vld [vmem:[#allocation6 + $0x18] sm:$0xff]  ;;  %s365_s2 = smov [#allocation9]  }
  0x39   :  { %v231_v5 = vpack.c.bf16 %v60_v3, %v59_v2  ;;  %v234_v7 = vpack.c.bf16 %v62_v6, %v61_v4  ;;  %v63_v8 = vld [vmem:[#allocation6 + $0x20] sm:$0xff]  ;;  %v64_v9 = vld [vmem:[#allocation6 + $0x28] sm:$0xff]  ;;  %v65_v11 = vld [vmem:[#allocation6 + $0x30] sm:$0xff]  ;;  %s167_s22 = sshll.u32 %s365_s2, 4  ;;  %s168_s22 = int_to_ptr.vmem [resolvable:$true] %s167_s22 }
  0x3a   :  { %v237_v10 = vpack.c.bf16 %v64_v9, %v63_v8  ;;  %v66_v12 = vld [vmem:[#allocation6 + $0x38] sm:$0xff]  ;;  %v67_v14 = vld [vmem:[#allocation6 + $0x40] sm:$0xff]  ;;  %v68_v15 = vld [vmem:[#allocation6 + $0x48] sm:$0xff]  ;;  %s329_s23 = scalar_lea.vmem %s168_s22, 128  ;;  %p334_p11 = scmp.lt.s32.totalorder %s168_s22, %s168_s22 }
  0x3b   :  { %232 = vmatpush3.bf16.msra.mxu0 %v231_v5  ;;  %v240_v13 = vpack.c.bf16 %v66_v12, %v65_v11  ;;  %v243_v16 = vpack.c.bf16 %v68_v15, %v67_v14  ;;  %v69_v17 = vld [vmem:[#allocation6 + $0x50] sm:$0xff]  ;;  %v70_v18 = vld [vmem:[#allocation6 + $0x58] sm:$0xff]  ;;  %v71_v20 = vld [vmem:[#allocation6 + $0x60] sm:$0xff]  ;;  %p330_p10 = scmp.ne.s32.totalorder %s168_s22, %s329_s23  ;;  %p335_p12 = scmp.lt.s32.totalorder %s329_s23, %s329_s23 }
  0x3c   :  { %233 = vmatprep.subr.bf16.mxu0 %v362_v0  ;;  %v246_v19 = vpack.c.bf16 %v70_v18, %v69_v17  ;;  %v72_v21 = vld [vmem:[#allocation6 + $0x68] sm:$0xff]  ;;  %v73_v23 = vld [vmem:[#allocation6 + $0x70] sm:$0xff]  ;;  %v74_v24 = vld [vmem:[#allocation6 + $0x78] sm:$0xff] }
  0x3d   :  { %v249_v22 = vpack.c.bf16 %v72_v21, %v71_v20  ;;  %v252_v25 = vpack.c.bf16 %v74_v24, %v73_v23  ;;  %v58_v26 = vld [vmem:[#allocation3] sm:$0xff]  ;;  %v177_v27 = vld [vmem:[#allocation8] ss:$0 sm:$0xff]  ;;  %p336_p13 = por %p335_p12, %p334_p11 }
  0x3f   :  { %235 = vmatpush3.bf16.msra.mxu0 %v234_v7  ;;  %p337_p0 = pnand %p336_p13, %p330_p10 }
  0x40   :  { %236 = vmatprep.subr.bf16.mxu0 %v362_v0 }
  0x43   :  { %238 = vmatpush3.bf16.msra.mxu0 %v237_v10 }
  0x44   :  { %239 = vmatprep.subr.bf16.mxu0 %v362_v0 }
  0x47   :  { %241 = vmatpush3.bf16.msra.mxu0 %v240_v13 }
  0x48   :  { %242 = vmatprep.subr.bf16.mxu0 %v362_v0 }
  0x4b   :  { %244 = vmatpush3.bf16.msra.mxu0 %v243_v16 }
  0x4c   :  { %245 = vmatprep.subr.bf16.mxu0 %v362_v0 }
  0x4f   :  { %247 = vmatpush3.bf16.msra.mxu0 %v246_v19 }
  0x50   :  { %248 = vmatprep.subr.bf16.mxu0 %v362_v0 }
  0x53   :  { %250 = vmatpush3.bf16.msra.mxu0 %v249_v22 }
  0x54   :  { %251 = vmatprep.subr.bf16.mxu0 %v362_v0 }
  0x57   :  { %253 = vmatpush3.bf16.msra.mxu0 %v252_v25 }
  0x5a   :  { %228 = vmatmul.mubr.f32.vlgmr.msra.gmra.mrb[0].mxu0 %v58_v26 }
 0x12d   :  { %v141_v28 = vpop.f32.mrb[0].mxu0 }
 0x12e   :  { %v158_v29 = vadd.f32 %v177_v27, %v141_v28  ;;  %v229_v30 = vpop.f32.mrb[1].mxu0 }
 0x130   :  { %v159_v31 = vmax.f32 %v158_v29, 0.0 }
 0x132   :  { %160 = vst [vmem:[#allocation9] sm:$0xff] %v159_v31 }
 0x133   :  { %340 = shalt.err (!%p337_p0)
}
 0x134   :  { %s341_s26 = scalar_lea.hbm %s437_s3, 128 }
 0x135   :  { %p342_p1 = scmp.ne.s32.totalorder %s437_s3, %s341_s26  ;;  %p345_p2 = scmp.lt.u32.totalorder %s341_s26, %s437_s3 }
 0x137   :  { %p347_p3 = pnand %p345_p2, %p342_p1 }
 0x139   :  { %350 = shalt.err (!%p347_p3)
}
 0x13a   :  { %170 = dma.vmem_to_hbm [thread:$0]  %s168_s22, 128, %s437_s3, [#allocation5]  }
 0x13b   :  { %355 = dma.done.wait [#allocation5], 128  }
 0x13c   :  { %356 = vsyncadd [#allocation5], 4294967168 }
 0x13d   :  { %174 = vsyncpa [#allocation4], 1 }
 0x13e   :  { %175 = vsyncpa [#allocation7], 1 }
 0x13f   :  { %176 = vsyncpa [#allocation5], 1 }

</bundles_post_ra>
